<compile_context>
chip_gen: v7x
topology: tpu7x:2x2x1
jax: 0.10.0
libtpu: 0.0.40
codegen_flags: <defaults>
</compile_context>

<pallas_src>
import functools
import math

import jax
import jax.numpy as jnp
from jax.experimental import pallas as pl
from jax.experimental.pallas import tpu as pltpu


def _round_up(x, m):
    return ((x + m - 1) // m) * m


def _fused_latent_kernel(x_ref, w_ref, b_ref, out_ref, *, out_features):
    """Single fused GEMM producing [mu | exp(log_cov_diag) | cov_factor] packed
    along a lane-dense, 128-padded output dimension."""
    x = x_ref[...]
    y = jnp.dot(x, w_ref[...], preferred_element_type=jnp.float32) + b_ref[...]
    # Columns [O, 2O) carry the log-cov-diag logits -> exponentiate only those.
    col = jax.lax.broadcasted_iota(jnp.int32, y.shape, 1)
    is_diag = (col >= out_features) & (col < 2 * out_features)
    out_ref[...] = jnp.where(is_diag, jnp.exp(y), y)


def latent_lowrank_forward(x, params, out_features, rank, *,
                           compute_dtype=jnp.float32, bs_tile=512):
    """Returns (loc, cov_factor, cov_diag, capacitance_tril) matching the
    parameters of the LowRankMultivariateNormal built in the PyTorch forward
    (including the unsqueeze(1))."""
    bs, in_features = x.shape
    O, R = out_features, rank
    w_mu, b_mu, w_ld, b_ld, w_cf, b_cf = params
    n_valid = 2 * O + O * R

    # ---- fuse + pad weights to one lane-dense (K, N_pad) matrix ------------
    w_fused = jnp.concatenate([w_mu, w_ld, w_cf], axis=1)          # (K, n_valid)
    b_fused = jnp.concatenate([b_mu, b_ld, b_cf], axis=1)          # (1, n_valid)
    n_pad = _round_up(n_valid, 128)
    if n_pad != n_valid:
        w_fused = jnp.pad(w_fused, ((0, 0), (0, n_pad - n_valid)))
        b_fused = jnp.pad(b_fused, ((0, 0), (0, n_pad - n_valid)))

    # ---- pad / tile the batch dimension ------------------------------------
    tile = min(bs_tile, _round_up(bs, 8))        # multiple of 8 (sublanes)
    bs_pad = _round_up(bs, tile)
    x_p = jnp.pad(x, ((0, bs_pad - bs), (0, 0))) if bs_pad != bs else x

    # Optional bf16 operands (accumulation stays fp32 via preferred_element_type).
    x_p = x_p.astype(compute_dtype)
    w_in = w_fused.astype(compute_dtype)
    b_in = b_fused.astype(jnp.float32)           # bias add + exp stay fp32

    elem = jnp.dtype(compute_dtype).itemsize
    cost = pl.CostEstimate(
        flops=2 * bs_pad * in_features * n_pad,
        transcendentals=bs_pad * n_pad,
        bytes_accessed=(bs_pad * in_features * elem       # x
                        + in_features * n_pad * elem      # fused weight
                        + n_pad * 4                       # fused bias
                        + bs_pad * n_pad * 4),            # packed output
    )

    # VMEM budget: double-buffered streamed tiles + resident weight/bias,
    # with headroom; capped to fit v7x's smaller physical VMEM.
    vmem_budget = (2 * (tile * in_features * elem + tile * n_pad * 4)
                   + 2 * (in_features * n_pad * elem + n_pad * 4)
                   + (1 << 20))
    vmem_budget = int(min(max(vmem_budget, 4 << 20), 64 << 20))

    fused_out = pl.pallas_call(
        functools.partial(_fused_latent_kernel, out_features=O),
        out_shape=jax.ShapeDtypeStruct((bs_pad, n_pad), jnp.float32),
        grid=(bs_pad // tile,),
        in_specs=[
            pl.BlockSpec((tile, in_features), lambda i: (i, 0)),   # stream x
            pl.BlockSpec((in_features, n_pad), lambda i: (0, 0)),  # resident W
            pl.BlockSpec((1, n_pad), lambda i: (0, 0)),            # resident b
        ],
        out_specs=pl.BlockSpec((tile, n_pad), lambda i: (i, 0)),
        compiler_params=pltpu.CompilerParams(
            dimension_semantics=("parallel",),
            vmem_limit_bytes=vmem_budget,
        ),
        cost_estimate=cost,
    )(x_p, w_in, b_in)

    # ---- unpack (strip batch + lane padding) --------------------------------
    out = fused_out[:bs]
    loc = out[:, 0:O]
    cov_diag = out[:, O:2 * O]
    cov_factor = out[:, 2 * O:2 * O + O * R].reshape(bs, O, R)

    # Mimic the unsqueeze(1) done before constructing the distribution.
    loc_u = loc[:, None, :]                      # (bs, 1, O)
    cov_factor_u = cov_factor[:, None, :, :]     # (bs, 1, O, R)
    cov_diag_u = cov_diag[:, None, :]            # (bs, 1, O)

    # LowRankMultivariateNormal.__init__ eagerly computes
    # capacitance_tril = cholesky(I + W^T D^{-1} W) (rank x rank per batch).
    # Tiny op -> plain JAX glue.
    wt_dinv = jnp.swapaxes(cov_factor_u, -1, -2) / cov_diag_u[..., None, :]
    capacitance = jnp.eye(R, dtype=jnp.float32) + wt_dinv @ cov_factor_u
    capacitance_tril = jnp.linalg.cholesky(capacitance)

    # TODO(synk): rsample() / kl_divergence of the distribution are not part of
    # forward() and are left to plain JAX if needed.
    return loc_u, cov_factor_u, cov_diag_u, capacitance_tril


def init_params(key, in_features, out_features, rank):
    """Deterministic init matching the PyTorch __init__ semantics:
    mu_fc uses default Linear init; log_cov_diag_fc / cov_factor_fc are zeroed."""
    k_w, k_b = jax.random.split(key)
    bound = 1.0 / math.sqrt(in_features)
    # stored transposed: (in_features, out)
    w_mu = jax.random.uniform(k_w, (in_features, out_features), jnp.float32,
                              -bound, bound)
    b_mu = jax.random.uniform(k_b, (1, out_features), jnp.float32,
                              -bound, bound)
    w_ld = jnp.zeros((in_features, out_features), jnp.float32)
    b_ld = jnp.zeros((1, out_features), jnp.float32)
    w_cf = jnp.zeros((in_features, out_features * rank), jnp.float32)
    b_cf = jnp.zeros((1, out_features * rank), jnp.float32)
    return (w_mu, b_mu, w_ld, b_ld, w_cf, b_cf)


if __name__ == "__main__":
    bs, in_features, out_features, rank = 8, 32, 16, 5

    key = jax.random.PRNGKey(0)
    k_x, k_p = jax.random.split(key)
    x = jax.random.normal(k_x, (bs, in_features), jnp.float32)
    params = init_params(k_p, in_features, out_features, rank)

    # fp32 path (exact check against the plain-JAX reference).
    loc, cov_factor, cov_diag, cap_tril = jax.block_until_ready(
        latent_lowrank_forward(x, params, out_features, rank)
    )

    w_mu, b_mu, w_ld, b_ld, w_cf, b_cf = params
    loc_ref = (x @ w_mu + b_mu)[:, None, :]
    covd_ref = jnp.exp(x @ w_ld + b_ld)[:, None, :]
    covf_ref = (x @ w_cf + b_cf).reshape(bs, out_features, rank)[:, None, :, :]

    assert loc.shape == (bs, 1, out_features)
    assert cov_diag.shape == (bs, 1, out_features)
    assert cov_factor.shape == (bs, 1, out_features, rank)
    assert cap_tril.shape == (bs, 1, rank, rank)
    assert jnp.allclose(loc, loc_ref, atol=1e-5)
    assert jnp.allclose(cov_diag, covd_ref, atol=1e-5)
    assert jnp.allclose(cov_factor, covf_ref, atol=1e-5)

    # bf16-operand path (fp32 accumulation) — the v6e/v7x fast path.
    loc16, covf16, covd16, _ = jax.block_until_ready(
        latent_lowrank_forward(x, params, out_features, rank,
                               compute_dtype=jnp.bfloat16)
    )
    assert jnp.allclose(loc16, loc_ref, atol=5e-2)
    assert jnp.allclose(covd16, covd_ref, atol=5e-2)
    assert jnp.allclose(covf16, covf_ref, atol=5e-2)

    print("KERNEL_OK")
</pallas_src>

<mosaic_0001>
module attributes {stable_mosaic.version = 11 : i64} {
  func.func @_fused_latent_kernel(%arg0: i32, %arg1: memref<8x32xf32, #tpu.memory_space<vmem>>, %arg2: memref<32x128xf32, #tpu.memory_space<vmem>>, %arg3: memref<1x128xf32, #tpu.memory_space<vmem>>, %arg4: memref<8x128xf32, #tpu.memory_space<vmem>>) attributes {dimension_semantics = [#tpu.dimension_semantics<parallel>], iteration_bounds = array<i64: 1>, scalar_prefetch = 0 : i64, scratch_operands = 0 : i64, tpu.core_type = #tpu.core_type<tc>, window_params = [{transform_indices = @transform_0, window_bounds = array<i64: 8, 32>}, {pipeline_mode = #tpu.pipeline_mode<synchronous>, transform_indices = @transform_1, window_bounds = array<i64: 32, 128>}, {pipeline_mode = #tpu.pipeline_mode<synchronous>, transform_indices = @transform_2, window_bounds = array<i64: 1, 128>}, {transform_indices = @transform_3, window_bounds = array<i64: 8, 128>}]} {
    %c0 = arith.constant 0 : index
    %c0_0 = arith.constant 0 : index
    %0 = vector.load %arg1[%c0, %c0_0] : memref<8x32xf32, #tpu.memory_space<vmem>>, vector<8x32xf32>
    %c0_1 = arith.constant 0 : index
    %c0_2 = arith.constant 0 : index
    %1 = vector.load %arg2[%c0_1, %c0_2] : memref<32x128xf32, #tpu.memory_space<vmem>>, vector<32x128xf32>
    %cst = arith.constant dense<0.000000e+00> : vector<8x128xf32>
    %2 = tpu.matmul %0, %1, %cst {dimension_numbers = #tpu.dot_dimension_numbers<[1], [0], [0], [1], [0, 0, 1, 1], [], []>} : vector<8x32xf32>, vector<32x128xf32>, vector<8x128xf32> -> vector<8x128xf32>
    %c0_3 = arith.constant 0 : index
    %c0_4 = arith.constant 0 : index
    %3 = vector.load %arg3[%c0_3, %c0_4] : memref<1x128xf32, #tpu.memory_space<vmem>>, vector<1x128xf32>
    %4 = vector.broadcast %3 : vector<1x128xf32> to vector<8x128xf32>
    %5 = arith.addf %2, %4 : vector<8x128xf32>
    %6 = tpu.iota {dimensions = array<i32: 1>} : vector<8x128xi32>
    %c16_i32 = arith.constant 16 : i32
    %7 = vector.broadcast %c16_i32 : i32 to vector<8x128xi32>
    %8 = arith.cmpi sge, %6, %7 : vector<8x128xi32>
    %c32_i32 = arith.constant 32 : i32
    %9 = vector.broadcast %c32_i32 : i32 to vector<8x128xi32>
    %10 = arith.cmpi slt, %6, %9 : vector<8x128xi32>
    %11 = arith.andi %8, %10 : vector<8x128xi1>
    %12 = math.exp %5 : vector<8x128xf32>
    %13 = arith.select %11, %12, %5 : vector<8x128xi1>, vector<8x128xf32>
    %c0_5 = arith.constant 0 : index
    %c0_6 = arith.constant 0 : index
    %14 = vector.load %arg4[%c0_5, %c0_6] : memref<8x128xf32, #tpu.memory_space<vmem>>, vector<8x128xf32>
    tpu.vector_store %arg4[%c0_5, %c0_6], %13 {strides = array<i32>} : memref<8x128xf32, #tpu.memory_space<vmem>>, vector<8x128xf32>,
    return
  }
  func.func @transform_0(%arg0: i32) -> (i32, i32) {
    %c0_i32 = arith.constant 0 : i32
    %c0_i32_0 = arith.constant 0 : i32
    return %arg0, %c0_i32 : i32, i32
  }
  func.func @transform_1(%arg0: i32) -> (i32, i32) {
    %c0_i32 = arith.constant 0 : i32
    %c0_i32_0 = arith.constant 0 : i32
    %c0_i32_1 = arith.constant 0 : i32
    return %c0_i32, %c0_i32_0 : i32, i32
  }
  func.func @transform_2(%arg0: i32) -> (i32, i32) {
    %c0_i32 = arith.constant 0 : i32
    %c0_i32_0 = arith.constant 0 : i32
    %c0_i32_1 = arith.constant 0 : i32
    return %c0_i32, %c0_i32_0 : i32, i32
  }
  func.func @transform_3(%arg0: i32) -> (i32, i32) {
    %c0_i32 = arith.constant 0 : i32
    %c0_i32_0 = arith.constant 0 : i32
    return %arg0, %c0_i32 : i32, i32
  }
}

</mosaic_0001>

<bundles_post_ra>
// kernel: tpu_custom_call.1
= control target key start
LH: loop header
LB: loop body
LE: loop exit
PB: predicated region body
PF: predicated region fallthrough
CT: control target
= control target key end

     0   :  { %8 = vsyncpa [#allocation3], 0  ;;  %s332_s0 = inlined_call_operand.hbm [shape: f32[8,32], index: 0, kind: input, shape index: {}]   ;;  %s333_s1 = inlined_call_operand.hbm [shape: f32[32,128], index: 1, kind: input, shape index: {}]   ;;  %s334_s2 = inlined_call_operand.vmem [shape: f32[1,128], index: 2, kind: input, shape index: {}]   ;;  %s335_s3 = inlined_call_operand.hbm [shape: f32[8,128], index: 3, kind: output, shape index: {}]  }
   0x1   :  { %9 = vsyncpa [#allocation6], 0 }
   0x2   :  { %10 = vsyncpa [#allocation4], 0  ;;  %s258_s12 = smov [#allocation2]   ;;  %s259_s14 = smov [#allocation5]  }
   0x3   :  { %s17_s13 = sshll.u32 %s258_s12, 4  ;;  %s26_s15 = sshll.u32 %s259_s14, 4  ;;  %s18_s13 = int_to_ptr.vmem [resolvable:$true] %s17_s13  ;;  %s286_s15 = int_to_ptr.vmem [resolvable:$true] %s26_s15 }
   0x4   :  { %s186_s18 = scalar_lea.hbm %s332_s0, 128 }
   0x5   :  { %p187_p0 = scmp.ne.s32.totalorder %s332_s0, %s186_s18  ;;  %p190_p1 = scmp.lt.u32.totalorder %s186_s18, %s332_s0 }
   0x7   :  { %p192_p2 = pnand %p190_p1, %p187_p0 }
   0x9   :  { %195 = shalt.err (!%p192_p2)
}
   0xa   :  { %s196_s23 = scalar_lea.vmem %s18_s13, 128  ;;  %p201_p4 = scmp.lt.s32.totalorder %s18_s13, %s18_s13 }
   0xb   :  { %p197_p3 = scmp.ne.s32.totalorder %s18_s13, %s196_s23  ;;  %p202_p5 = scmp.lt.s32.totalorder %s196_s23, %s196_s23 }
   0xd   :  { %p203_p6 = por %p202_p5, %p201_p4 }
   0xf   :  { %p204_p7 = pnand %p203_p6, %p197_p3 }
  0x11   :  { %207 = shalt.err (!%p204_p7)
}
  0x12   :  { %20 = dma.hbm_to_vmem [thread:$0]  %s332_s0, 128, %s18_s13, [#allocation3]  }
  0x13   :  { %s208_s28 = scalar_lea.hbm %s333_s1, 512 }
  0x14   :  { %p209_p8 = scmp.ne.s32.totalorder %s333_s1, %s208_s28  ;;  %p212_p9 = scmp.lt.u32.totalorder %s208_s28, %s333_s1 }
  0x16   :  { %p214_p10 = pnand %p212_p9, %p209_p8 }
  0x18   :  { %217 = shalt.err (!%p214_p10)
}
  0x19   :  { %s218_s6 = scalar_lea.vmem %s286_s15, 512  ;;  %p223_p12 = scmp.lt.s32.totalorder %s286_s15, %s286_s15 }
  0x1a   :  { %p219_p11 = scmp.ne.s32.totalorder %s286_s15, %s218_s6  ;;  %p224_p13 = scmp.lt.s32.totalorder %s218_s6, %s218_s6 }
  0x1c   :  { %p225_p0 = por %p224_p13, %p223_p12 }
  0x1e   :  { %p226_p1 = pnand %p225_p0, %p219_p11 }
  0x20   :  { %229 = shalt.err (!%p226_p1)
}
  0x21   :  { %s260_s0 = smov 128   ;;  %s261_s7 = smov 8  }
  0x22   :  { %32 = dma.hbm_to_vmem [thread:$0]  %s333_s1, 512, %s286_s15, [#allocation6], %s260_s0, %s260_s0, %s261_s7  }
  0x23   :  { %252 = dma.done.wait [#allocation3], 128  }
  0x24   :  { %253 = vsyncadd [#allocation3], 4294967168 }
  0x25   :  { %254 = dma.done.wait [#allocation6], 512  }
  0x26   :  { %255 = vsyncadd [#allocation6], 4294966784  ;;  %v262_v0 = vmov 0.0|0.0   ;;  %vm263_vm0 = vmmov 0   ;;  %v264_v1 = vmov 0.0   ;;  %v42_v2 = vld [vmem:[#allocation5] sm:$0xff]  ;;  %v127_v13 = vlaneseq }
  0x27   :  { %170 = vmatprep.subr.bf16.mxu0 %v262_v0  ;;  %167 = vmatprep.mubr.msk.f32.mxu0 %vm263_vm0, %v264_v1  ;;  %v43_v3 = vld [vmem:[#allocation5 + $0x8] sm:$0xff]  ;;  %v44_v4 = vld [vmem:[#allocation5 + $0x10] sm:$0xff]  ;;  %v45_v6 = vld [vmem:[#allocation5 + $0x18] sm:$0xff]  ;;  %vm53_vm1 = vcmask 261120   ;;  %s265_s11 = smov [#allocation7]  }
  0x28   :  { %v171_v5 = vpack.c.bf16 %v43_v3, %v42_v2  ;;  %v174_v7 = vpack.c.bf16 %v45_v6, %v44_v4  ;;  %v41_v8 = vld [vmem:[#allocation2] sm:$0xff]  ;;  %v128_v15 = vand.u32 127, %v127_v13  ;;  %s142_s12 = sshll.u32 %s265_s11, 4  ;;  %s143_s12 = int_to_ptr.vmem [resolvable:$true] %s142_s12 }
  0x29   :  { %v152_v9 = vld [vmem:[%s334_s2] ss:$0 sm:$0xff]  ;;  %s230_s13 = scalar_lea.vmem %s143_s12, 128  ;;  %p235_p3 = scmp.lt.s32.totalorder %s143_s12, %s143_s12 }
  0x2a   :  { %172 = vmatpush3.bf16.msra.mxu0 %v171_v5  ;;  %vm129_vm2 = vcmp.ge.s32.totalorder %v128_v15, 16  ;;  %vm130_vm3 = vcmp.lt.s32.totalorder %v128_v15, 32  ;;  %p231_p2 = scmp.ne.s32.totalorder %s143_s12, %s230_s13  ;;  %p236_p4 = scmp.lt.s32.totalorder %s230_s13, %s230_s13 }
  0x2b   :  { %173 = vmatprep.subr.bf16.mxu0 %v262_v0  ;;  %vm131_vm4 = vmand %vm129_vm2, %vm130_vm3 }
  0x2c   :  { %p237_p5 = por %p236_p4, %p235_p3 }
  0x2e   :  { %175 = vmatpush3.bf16.msra.mxu0 %v174_v7  ;;  %p238_p6 = pnand %p237_p5, %p231_p2 }
  0x31   :  { %168 = vmatmul.mubr.msk.f32.vlgmr.msra.gmra.mrb[0].mxu0 %vm53_vm1, %v41_v8 }
 0x104   :  { %v123_v10 = vpop.f32.mrb[0].mxu0 }
 0x105   :  { %v124_v11 = vadd.f32 %v152_v9, %v123_v10  ;;  %v169_v12 = vpop.f32.mrb[1].mxu0 }
 0x107   :  { %v132_v14 = vmul.f32 1.442695, %v124_v11 }
 0x109   :  { %184 = vpow2.f32 %v132_v14 }
 0x113   :  { %v185_v16 = vpop.eup %184 }
 0x114   :  { %v134_v17 = vsel %vm131_vm4, %v185_v16, %v124_v11 }
 0x115   :  { %135 = vst [vmem:[#allocation7] sm:$0xff] %v134_v17 }
 0x116   :  { %241 = shalt.err (!%p238_p6)
}
 0x117   :  { %s242_s15 = scalar_lea.hbm %s335_s3, 128 }
 0x118   :  { %p243_p7 = scmp.ne.s32.totalorder %s335_s3, %s242_s15  ;;  %p246_p8 = scmp.lt.u32.totalorder %s242_s15, %s335_s3 }
 0x11a   :  { %p248_p9 = pnand %p246_p8, %p243_p7 }
 0x11c   :  { %251 = shalt.err (!%p248_p9)
}
 0x11d   :  { %145 = dma.vmem_to_hbm [thread:$0]  %s143_s12, 128, %s335_s3, [#allocation4]  }
 0x11e   :  { %256 = dma.done.wait [#allocation4], 128  }
 0x11f   :  { %257 = vsyncadd [#allocation4], 4294967168 }
 0x120   :  { %149 = vsyncpa [#allocation3], 1 }
 0x121   :  { %150 = vsyncpa [#allocation6], 1 }
 0x122   :  { %151 = vsyncpa [#allocation4], 1 }

</bundles_post_ra>
